<compile_context>
chip_gen: v5e
topology: v5e:2x2
jax: 0.10.0
libtpu: 0.0.40
codegen_flags: <defaults>
</compile_context>

<pallas_src>
import functools
import math

import jax
import jax.numpy as jnp
from jax.experimental import pallas as pl
from jax.experimental.pallas import tpu as pltpu


# ---------------- fused Pallas kernel ----------------

def _textcnn_kernel(*refs, BB, S, F, OC, KHS):
    """One batch-block of the fused forward, fully resident in VMEM."""
    nconv = len(KHS)
    x_ref = refs[0]                       # (BB*S, F)       f32
    wconv_refs = refs[1:1 + nconv]        # (kh*F, OC)      bf16 per conv
    bconv_ref = refs[1 + nconv]           # (nconv, 1, OC)  f32
    wfc_ref = refs[2 + nconv]             # (nconv*OC, emb) bf16
    bfc_ref = refs[3 + nconv]             # (1, emb)        f32
    out_ref = refs[4 + nconv]             # (BB, emb)       f32

    x = x_ref[...]                                                    # (BB*S, F) f32

    # Time-shifted copies of the narrow input: shifted[dh][i] == x[i + dh] for
    # i < BB*S - dh.  Wrapped tail rows only feed conv outputs at t >= L, which
    # are masked to -inf before the max-pool, so they never win.
    max_kh = max(KHS)
    shifted = [x]
    for dh in range(1, max_kh):
        shifted.append(jnp.concatenate([x[dh:, :], x[:dh, :]], axis=0))

    t_idx = jax.lax.broadcasted_iota(jnp.int32, (BB, S, OC), 1)       # time index per row

    pooled_blocks = []
    for ci, kh in enumerate(KHS):
        L = S - kh + 1                                                # valid conv length
        cols = jnp.concatenate(shifted[:kh], axis=-1)                 # (BB*S, kh*F) im2col (f32)
        y = jnp.dot(cols.astype(wconv_refs[ci].dtype),                # bf16 MXU operands,
                    wconv_refs[ci][...],                              # f32 accumulation
                    preferred_element_type=jnp.float32)               # (BB*S, OC), K = kh*F
        y = y.reshape(BB, S, OC)                                      # S % 8 == 0 -> clean split
        y = jnp.where(t_idx < L, y, -jnp.inf)                         # mask invalid time taps
        pooled_pre = jnp.max(y, axis=1)                               # (BB, OC): pool first ...
        pooled_blocks.append(jnp.maximum(pooled_pre + bconv_ref[ci], 0.0))  # ... then bias + ReLU

    # TODO(synk): nn.Dropout is identity at inference; no RNG drop mask is applied here.
    pooled = jnp.concatenate(pooled_blocks, axis=-1)                  # (BB, nconv*OC) f32
    h = jnp.dot(pooled.astype(wfc_ref.dtype), wfc_ref[...],           # single fused FC matmul
                preferred_element_type=jnp.float32)                   # (BB, emb)
    out_ref[...] = jnp.maximum(h + bfc_ref[...], 0.0)                 # Sequential(Linear, ReLU)


# ---------------- wrapper ----------------

def _pick_batch_block(B, S, max_rows=2048, batch_block=None):
    """Batch elements per grid step.  Must divide B; a multiple of 8 (or the whole
    batch) keeps the (BB, emb) output block sublane-aligned.  max_rows keeps the
    per-block (BB*S, *) intermediates comfortably inside v7x's 64 MiB VMEM."""
    if batch_block is not None:
        assert B % batch_block == 0, "batch_block must divide batch"
        return batch_block
    if B <= 8 or B % 8 != 0:
        return B                          # single block (grid of 1)
    limit = max(8, max_rows // S)
    bb = 8
    cand = 16
    while cand <= min(B, limit):
        if B % cand == 0:
            bb = cand
        cand += 8
    return bb


def textcnn_forward(frame_x, packed, *, kernel_heights, out_channels, emb_size,
                    batch_block=None):
    B, S, F = frame_x.shape
    assert S >= max(kernel_heights), "seq_len must cover the largest conv kernel"
    assert S % 8 == 0, "seq_len must be a multiple of 8 (in-kernel (B*S,*) <-> (B,S,*) reshape)"

    BB = _pick_batch_block(B, S, batch_block=batch_block)
    grid = (B // BB,)

    x2d = frame_x.reshape(B * S, F)       # contiguous collapse; metadata-only in XLA

    kern = functools.partial(_textcnn_kernel, BB=BB, S=S, F=F, OC=out_channels,
                             KHS=tuple(kernel_heights))

    in_specs = [pl.BlockSpec((BB * S, F), lambda b: (b, 0))]                 # x: blocked over batch
    in_specs += [pl.BlockSpec(w.shape, lambda b: (0, 0)) for w in packed["wconv"]]  # resident
    in_specs += [
        pl.BlockSpec(packed["bconv"].shape, lambda b: (0, 0, 0)),
        pl.BlockSpec(packed["wfc"].shape, lambda b: (0, 0)),
        pl.BlockSpec(packed["bfc"].shape, lambda b: (0, 0)),
    ]
    out_specs = pl.BlockSpec((BB, emb_size), lambda b: (b, 0))

    return pl.pallas_call(
        kern,
        out_shape=jax.ShapeDtypeStruct((B, emb_size), jnp.float32),
        grid=grid,
        in_specs=in_specs,
        out_specs=out_specs,
        compiler_params=pltpu.CompilerParams(dimension_semantics=("parallel",)),
    )(x2d, *packed["wconv"], packed["bconv"], packed["wfc"], packed["bfc"])


# ---------------- parameter setup (packed ONCE, not per call) ----------------

def init_params(key, input_dim, out_channels, emb_size, kernel_heights):
    """Deterministic PyTorch-default-style init (uniform +-1/sqrt(fan_in))."""
    params = {"conv_w": [], "conv_b": []}
    keys = jax.random.split(key, 2 * len(kernel_heights) + 2)
    for ci, kh in enumerate(kernel_heights):
        fan_in = 1 * kh * input_dim
        bound = 1.0 / math.sqrt(fan_in)
        w = jax.random.uniform(keys[2 * ci], (out_channels, 1, kh, input_dim),
                               jnp.float32, -bound, bound)
        b = jax.random.uniform(keys[2 * ci + 1], (out_channels,), jnp.float32, -bound, bound)
        params["conv_w"].append(w)
        params["conv_b"].append(b)
    fc_in = len(kernel_heights) * out_channels
    bound = 1.0 / math.sqrt(fc_in)
    params["fc_w"] = jax.random.uniform(keys[-2], (emb_size, fc_in), jnp.float32, -bound, bound)
    params["fc_b"] = jax.random.uniform(keys[-1], (emb_size,), jnp.float32, -bound, bound)
    return params


def pack_params(params, kernel_heights, out_channels):
    """Per-conv im2col weight slabs (kh*F, OC), row index = dh*F + f.  MXU operands
    stored bf16; biases stay f32."""
    wconv = []
    for ci, kh in enumerate(kernel_heights):
        W = params["conv_w"][ci]                                    # (OC, 1, kh, F)
        F = W.shape[-1]
        w = jnp.transpose(W[:, 0, :, :], (1, 2, 0)).reshape(kh * F, out_channels)
        wconv.append(w.astype(jnp.bfloat16))
    return {
        "wconv": wconv,                                             # list of (kh*F, OC) bf16
        "bconv": jnp.stack(params["conv_b"], axis=0)[:, None, :],   # (nconv, 1, OC) f32
        "wfc": jnp.transpose(params["fc_w"]).astype(jnp.bfloat16),  # (nconv*OC, emb) bf16
        "bfc": params["fc_b"][None, :],                             # (1, emb) f32
    }


# ---------------- pure-JAX reference (correctness check) ----------------

def _forward_ref(frame_x, params, kernel_heights):
    B, S, F = frame_x.shape
    pooled = []
    for ci, kh in enumerate(kernel_heights):
        W = params["conv_w"][ci]                                    # (OC, 1, kh, F)
        b = params["conv_b"][ci]                                    # (OC,)
        L = S - kh + 1
        conv = jnp.zeros((B, L, W.shape[0]), jnp.float32)
        for dh in range(kh):
            conv = conv + jnp.einsum("blf,of->blo",
                                     frame_x[:, dh:dh + L, :], W[:, 0, dh, :])
        conv = conv + b[None, None, :]
        pooled.append(jnp.max(jax.nn.relu(conv), axis=1))           # (B, OC)
    all_out = jnp.concatenate(pooled, axis=1)                       # (B, 3*OC)
    # dropout is identity at inference
    return jax.nn.relu(all_out @ params["fc_w"].T + params["fc_b"])


if __name__ == "__main__":
    input_dim = 32          # feat_dim of frame_x
    emb_size = 128          # module default
    out_channels = 128      # module default (lane-dense)
    kernel_heights = [3, 4, 5]
    B, S = 2, 16            # small batch / sequence (S multiple of 8)

    key = jax.random.PRNGKey(0)
    kx, kp = jax.random.split(key)
    frame_x = jax.random.normal(kx, (B, S, input_dim), jnp.float32)

    params = init_params(kp, input_dim, out_channels, emb_size, kernel_heights)
    packed = pack_params(params, kernel_heights, out_channels)

    out = jax.block_until_ready(
        textcnn_forward(frame_x, packed, kernel_heights=kernel_heights,
                        out_channels=out_channels, emb_size=emb_size))
    ref = jax.block_until_ready(_forward_ref(frame_x, params, kernel_heights))
    assert out.shape == (B, emb_size)
    # bf16 MXU operands (f32 accumulation) -> loosened tolerance vs the f32 reference.
    assert bool(jnp.allclose(out, ref, rtol=3e-2, atol=3e-2)), \
        "Pallas output mismatch vs JAX reference (B=2)"

    # Larger batch exercises the parallel batch grid (2 steps of 8) / megacore path.
    B2 = 16
    frame_x2 = jax.random.normal(jax.random.PRNGKey(1), (B2, S, input_dim), jnp.float32)
    out2 = jax.block_until_ready(
        textcnn_forward(frame_x2, packed, kernel_heights=kernel_heights,
                        out_channels=out_channels, emb_size=emb_size, batch_block=8))
    ref2 = jax.block_until_ready(_forward_ref(frame_x2, params, kernel_heights))
    assert bool(jnp.allclose(out2, ref2, rtol=3e-2, atol=3e-2)), \
        "Pallas output mismatch vs JAX reference (B=16, gridded)"

    print("KERNEL_OK")
</pallas_src>

<mosaic_0001>
module attributes {stable_mosaic.version = 11 : i64} {
  func.func @_textcnn_kernel(%arg0: i32, %arg1: memref<32x32xf32, #tpu.memory_space<vmem>>, %arg2: memref<96x128xbf16, #tpu.memory_space<vmem>>, %arg3: memref<128x128xbf16, #tpu.memory_space<vmem>>, %arg4: memref<160x128xbf16, #tpu.memory_space<vmem>>, %arg5: memref<3x1x128xf32, #tpu.memory_space<vmem>>, %arg6: memref<384x128xbf16, #tpu.memory_space<vmem>>, %arg7: memref<1x128xf32, #tpu.memory_space<vmem>>, %arg8: memref<2x128xf32, #tpu.memory_space<vmem>>) attributes {dimension_semantics = [#tpu.dimension_semantics<parallel>], iteration_bounds = array<i64: 1>, scalar_prefetch = 0 : i64, scratch_operands = 0 : i64, tpu.core_type = #tpu.core_type<tc>, window_params = [{transform_indices = @transform_0, window_bounds = array<i64: 32, 32>}, {pipeline_mode = #tpu.pipeline_mode<synchronous>, transform_indices = @transform_1, window_bounds = array<i64: 96, 128>}, {pipeline_mode = #tpu.pipeline_mode<synchronous>, transform_indices = @transform_2, window_bounds = array<i64: 128, 128>}, {pipeline_mode = #tpu.pipeline_mode<synchronous>, transform_indices = @transform_3, window_bounds = array<i64: 160, 128>}, {pipeline_mode = #tpu.pipeline_mode<synchronous>, transform_indices = @transform_4, window_bounds = array<i64: 3, 1, 128>}, {pipeline_mode = #tpu.pipeline_mode<synchronous>, transform_indices = @transform_5, window_bounds = array<i64: 384, 128>}, {pipeline_mode = #tpu.pipeline_mode<synchronous>, transform_indices = @transform_6, window_bounds = array<i64: 1, 128>}, {transform_indices = @transform_7, window_bounds = array<i64: 2, 128>}]} {
    %c0 = arith.constant 0 : index
    %c0_0 = arith.constant 0 : index
    %0 = vector.load %arg1[%c0, %c0_0] : memref<32x32xf32, #tpu.memory_space<vmem>>, vector<32x32xf32>
    %1 = vector.extract_strided_slice %0 {offsets = [1, 0], sizes = [31, 32], strides = [1, 1]} : vector<32x32xf32> to vector<31x32xf32>
    %2 = vector.extract_strided_slice %0 {offsets = [0, 0], sizes = [1, 32], strides = [1, 1]} : vector<32x32xf32> to vector<1x32xf32>
    %3 = tpu.concatenate %1, %2 in 0 : vector<31x32xf32>, vector<1x32xf32> -> vector<32x32xf32>
    %4 = vector.extract_strided_slice %0 {offsets = [2, 0], sizes = [30, 32], strides = [1, 1]} : vector<32x32xf32> to vector<30x32xf32>
    %5 = vector.extract_strided_slice %0 {offsets = [0, 0], sizes = [2, 32], strides = [1, 1]} : vector<32x32xf32> to vector<2x32xf32>
    %6 = tpu.concatenate %4, %5 in 0 : vector<30x32xf32>, vector<2x32xf32> -> vector<32x32xf32>
    %7 = vector.extract_strided_slice %0 {offsets = [3, 0], sizes = [29, 32], strides = [1, 1]} : vector<32x32xf32> to vector<29x32xf32>
    %8 = vector.extract_strided_slice %0 {offsets = [0, 0], sizes = [3, 32], strides = [1, 1]} : vector<32x32xf32> to vector<3x32xf32>
    %9 = tpu.concatenate %7, %8 in 0 : vector<29x32xf32>, vector<3x32xf32> -> vector<32x32xf32>
    %10 = vector.extract_strided_slice %0 {offsets = [4, 0], sizes = [28, 32], strides = [1, 1]} : vector<32x32xf32> to vector<28x32xf32>
    %11 = vector.extract_strided_slice %0 {offsets = [0, 0], sizes = [4, 32], strides = [1, 1]} : vector<32x32xf32> to vector<4x32xf32>
    %12 = tpu.concatenate %10, %11 in 0 : vector<28x32xf32>, vector<4x32xf32> -> vector<32x32xf32>
    %13 = tpu.iota {dimensions = array<i32: 1>} : vector<2x16x128xi32>
    %14 = tpu.concatenate %0, %3, %6 in 1 : vector<32x32xf32>, vector<32x32xf32>, vector<32x32xf32> -> vector<32x96xf32>
    %15 = arith.truncf %14 : vector<32x96xf32> to vector<32x96xbf16>
    %c0_1 = arith.constant 0 : index
    %c0_2 = arith.constant 0 : index
    %16 = vector.load %arg2[%c0_1, %c0_2] : memref<96x128xbf16, #tpu.memory_space<vmem>>, vector<96x128xbf16>
    %cst = arith.constant dense<0.000000e+00> : vector<32x128xf32>
    %17 = tpu.matmul %15, %16, %cst {dimension_numbers = #tpu.dot_dimension_numbers<[1], [0], [0], [1], [0, 0, 1, 1], [], []>} : vector<32x96xbf16>, vector<96x128xbf16>, vector<32x128xf32> -> vector<32x128xf32>
    %18 = vector.shape_cast %17 : vector<32x128xf32> to vector<2x16x128xf32>
    %c14_i32 = arith.constant 14 : i32
    %19 = vector.broadcast %c14_i32 : i32 to vector<2x16x128xi32>
    %20 = arith.cmpi slt, %13, %19 : vector<2x16x128xi32>
    %cst_3 = arith.constant 0xFF800000 : f32
    %21 = vector.broadcast %cst_3 : f32 to vector<2x16x128xf32>
    %22 = arith.select %20, %18, %21 : vector<2x16x128xi1>, vector<2x16x128xf32>
    %cst_4 = arith.constant dense<0xFF800000> : vector<2x128xf32>
    %23 = vector.multi_reduction <maximumf>, %22, %cst_4 [1] : vector<2x16x128xf32> to vector<2x128xf32>
    %c0_5 = arith.constant 0 : index
    %c0_6 = arith.constant 0 : index
    %c0_7 = arith.constant 0 : index
    %24 = vector.load %arg5[%c0_5, %c0_6, %c0_7] : memref<3x1x128xf32, #tpu.memory_space<vmem>>, vector<1x1x128xf32>
    %25 = vector.shape_cast %24 : vector<1x1x128xf32> to vector<1x128xf32>
    %26 = vector.broadcast %25 : vector<1x128xf32> to vector<2x128xf32>
    %27 = arith.addf %23, %26 : vector<2x128xf32>
    %cst_8 = arith.constant 0.000000e+00 : f32
    %28 = vector.broadcast %cst_8 : f32 to vector<2x128xf32>
    %29 = arith.maximumf %27, %28 : vector<2x128xf32>
    %30 = tpu.concatenate %0, %3, %6, %9 in 1 : vector<32x32xf32>, vector<32x32xf32>, vector<32x32xf32>, vector<32x32xf32> -> vector<32x128xf32>
    %31 = arith.truncf %30 : vector<32x128xf32> to vector<32x128xbf16>
    %c0_9 = arith.constant 0 : index
    %c0_10 = arith.constant 0 : index
    %32 = vector.load %arg3[%c0_9, %c0_10] : memref<128x128xbf16, #tpu.memory_space<vmem>>, vector<128x128xbf16>
    %cst_11 = arith.constant dense<0.000000e+00> : vector<32x128xf32>
    %33 = tpu.matmul %31, %32, %cst_11 {dimension_numbers = #tpu.dot_dimension_numbers<[1], [0], [0], [1], [0, 0, 1, 1], [], []>} : vector<32x128xbf16>, vector<128x128xbf16>, vector<32x128xf32> -> vector<32x128xf32>
    %34 = vector.shape_cast %33 : vector<32x128xf32> to vector<2x16x128xf32>
    %c13_i32 = arith.constant 13 : i32
    %35 = vector.broadcast %c13_i32 : i32 to vector<2x16x128xi32>
    %36 = arith.cmpi slt, %13, %35 : vector<2x16x128xi32>
    %cst_12 = arith.constant 0xFF800000 : f32
    %37 = vector.broadcast %cst_12 : f32 to vector<2x16x128xf32>
    %38 = arith.select %36, %34, %37 : vector<2x16x128xi1>, vector<2x16x128xf32>
    %cst_13 = arith.constant dense<0xFF800000> : vector<2x128xf32>
    %39 = vector.multi_reduction <maximumf>, %38, %cst_13 [1] : vector<2x16x128xf32> to vector<2x128xf32>
    %c1 = arith.constant 1 : index
    %c0_14 = arith.constant 0 : index
    %c0_15 = arith.constant 0 : index
    %40 = vector.load %arg5[%c1, %c0_14, %c0_15] : memref<3x1x128xf32, #tpu.memory_space<vmem>>, vector<1x1x128xf32>
    %41 = vector.shape_cast %40 : vector<1x1x128xf32> to vector<1x128xf32>
    %42 = vector.broadcast %41 : vector<1x128xf32> to vector<2x128xf32>
    %43 = arith.addf %39, %42 : vector<2x128xf32>
    %cst_16 = arith.constant 0.000000e+00 : f32
    %44 = vector.broadcast %cst_16 : f32 to vector<2x128xf32>
    %45 = arith.maximumf %43, %44 : vector<2x128xf32>
    %46 = tpu.concatenate %0, %3, %6, %9, %12 in 1 : vector<32x32xf32>, vector<32x32xf32>, vector<32x32xf32>, vector<32x32xf32>, vector<32x32xf32> -> vector<32x160xf32>
    %47 = arith.truncf %46 : vector<32x160xf32> to vector<32x160xbf16>
    %c0_17 = arith.constant 0 : index
    %c0_18 = arith.constant 0 : index
    %48 = vector.load %arg4[%c0_17, %c0_18] : memref<160x128xbf16, #tpu.memory_space<vmem>>, vector<160x128xbf16>
    %cst_19 = arith.constant dense<0.000000e+00> : vector<32x128xf32>
    %49 = tpu.matmul %47, %48, %cst_19 {dimension_numbers = #tpu.dot_dimension_numbers<[1], [0], [0], [1], [0, 0, 1, 1], [], []>} : vector<32x160xbf16>, vector<160x128xbf16>, vector<32x128xf32> -> vector<32x128xf32>
    %50 = vector.shape_cast %49 : vector<32x128xf32> to vector<2x16x128xf32>
    %c12_i32 = arith.constant 12 : i32
    %51 = vector.broadcast %c12_i32 : i32 to vector<2x16x128xi32>
    %52 = arith.cmpi slt, %13, %51 : vector<2x16x128xi32>
    %cst_20 = arith.constant 0xFF800000 : f32
    %53 = vector.broadcast %cst_20 : f32 to vector<2x16x128xf32>
    %54 = arith.select %52, %50, %53 : vector<2x16x128xi1>, vector<2x16x128xf32>
    %cst_21 = arith.constant dense<0xFF800000> : vector<2x128xf32>
    %55 = vector.multi_reduction <maximumf>, %54, %cst_21 [1] : vector<2x16x128xf32> to vector<2x128xf32>
    %c2 = arith.constant 2 : index
    %c0_22 = arith.constant 0 : index
    %c0_23 = arith.constant 0 : index
    %56 = vector.load %arg5[%c2, %c0_22, %c0_23] : memref<3x1x128xf32, #tpu.memory_space<vmem>>, vector<1x1x128xf32>
    %57 = vector.shape_cast %56 : vector<1x1x128xf32> to vector<1x128xf32>
    %58 = vector.broadcast %57 : vector<1x128xf32> to vector<2x128xf32>
    %59 = arith.addf %55, %58 : vector<2x128xf32>
    %cst_24 = arith.constant 0.000000e+00 : f32
    %60 = vector.broadcast %cst_24 : f32 to vector<2x128xf32>
    %61 = arith.maximumf %59, %60 : vector<2x128xf32>
    %62 = tpu.concatenate %29, %45, %61 in 1 : vector<2x128xf32>, vector<2x128xf32>, vector<2x128xf32> -> vector<2x384xf32>
    %63 = arith.truncf %62 : vector<2x384xf32> to vector<2x384xbf16>
    %c0_25 = arith.constant 0 : index
    %c0_26 = arith.constant 0 : index
    %64 = vector.load %arg6[%c0_25, %c0_26] : memref<384x128xbf16, #tpu.memory_space<vmem>>, vector<384x128xbf16>
    %cst_27 = arith.constant dense<0.000000e+00> : vector<2x128xf32>
    %65 = tpu.matmul %63, %64, %cst_27 {dimension_numbers = #tpu.dot_dimension_numbers<[1], [0], [0], [1], [0, 0, 1, 1], [], []>} : vector<2x384xbf16>, vector<384x128xbf16>, vector<2x128xf32> -> vector<2x128xf32>
    %c0_28 = arith.constant 0 : index
    %c0_29 = arith.constant 0 : index
    %66 = vector.load %arg7[%c0_28, %c0_29] : memref<1x128xf32, #tpu.memory_space<vmem>>, vector<1x128xf32>
    %67 = vector.broadcast %66 : vector<1x128xf32> to vector<2x128xf32>
    %68 = arith.addf %65, %67 : vector<2x128xf32>
    %cst_30 = arith.constant 0.000000e+00 : f32
    %69 = vector.broadcast %cst_30 : f32 to vector<2x128xf32>
    %70 = arith.maximumf %68, %69 : vector<2x128xf32>
    %c0_31 = arith.constant 0 : index
    %c0_32 = arith.constant 0 : index
    %71 = vector.load %arg8[%c0_31, %c0_32] : memref<2x128xf32, #tpu.memory_space<vmem>>, vector<2x128xf32>
    tpu.vector_store %arg8[%c0_31, %c0_32], %70 {strides = array<i32>} : memref<2x128xf32, #tpu.memory_space<vmem>>, vector<2x128xf32>,
    return
  }
  func.func @transform_0(%arg0: i32) -> (i32, i32) {
    %c0_i32 = arith.constant 0 : i32
    %c0_i32_0 = arith.constant 0 : i32
    return %arg0, %c0_i32 : i32, i32
  }
  func.func @transform_1(%arg0: i32) -> (i32, i32) {
    %c0_i32 = arith.constant 0 : i32
    %c0_i32_0 = arith.constant 0 : i32
    %c0_i32_1 = arith.constant 0 : i32
    return %c0_i32, %c0_i32_0 : i32, i32
  }
  func.func @transform_2(%arg0: i32) -> (i32, i32) {
    %c0_i32 = arith.constant 0 : i32
    %c0_i32_0 = arith.constant 0 : i32
    %c0_i32_1 = arith.constant 0 : i32
    return %c0_i32, %c0_i32_0 : i32, i32
  }
  func.func @transform_3(%arg0: i32) -> (i32, i32) {
    %c0_i32 = arith.constant 0 : i32
    %c0_i32_0 = arith.constant 0 : i32
    %c0_i32_1 = arith.constant 0 : i32
    return %c0_i32, %c0_i32_0 : i32, i32
  }
  func.func @transform_4(%arg0: i32) -> (i32, i32, i32) {
    %c0_i32 = arith.constant 0 : i32
    %c0_i32_0 = arith.constant 0 : i32
    %c0_i32_1 = arith.constant 0 : i32
    %c0_i32_2 = arith.constant 0 : i32
    return %c0_i32, %c0_i32_0, %c0_i32_1 : i32, i32, i32
  }
  func.func @transform_5(%arg0: i32) -> (i32, i32) {
    %c0_i32 = arith.constant 0 : i32
    %c0_i32_0 = arith.constant 0 : i32
    %c0_i32_1 = arith.constant 0 : i32
    return %c0_i32, %c0_i32_0 : i32, i32
  }
  func.func @transform_6(%arg0: i32) -> (i32, i32) {
    %c0_i32 = arith.constant 0 : i32
    %c0_i32_0 = arith.constant 0 : i32
    %c0_i32_1 = arith.constant 0 : i32
    return %c0_i32, %c0_i32_0 : i32, i32
  }
  func.func @transform_7(%arg0: i32) -> (i32, i32) {
    %c0_i32 = arith.constant 0 : i32
    %c0_i32_0 = arith.constant 0 : i32
    return %arg0, %c0_i32 : i32, i32
  }
}

</mosaic_0001>

<bundles_post_ra>
// kernel: tpu_custom_call.1
= control target key start
LH: loop header
LB: loop body
LE: loop exit
PB: predicated region body
PF: predicated region fallthrough
CT: control target
= control target key end

     0   :  { %12 = vsyncpa [#allocation3], 0  ;;  %s1489_s0 = inlined_call_operand.hbm [shape: f32[32,32], index: 0, kind: input, shape index: {}]   ;;  %s1490_s1 = inlined_call_operand.hbm [shape: bf16[96,128], index: 1, kind: input, shape index: {}]   ;;  %s1491_s2 = inlined_call_operand.hbm [shape: bf16[128,128], index: 2, kind: input, shape index: {}]   ;;  %s1492_s3 = inlined_call_operand.hbm [shape: bf16[160,128], index: 3, kind: input, shape index: {}]   ;;  %s1493_s4 = inlined_call_operand.vmem [shape: f32[3,1,128], index: 4, kind: input, shape index: {}]   ;;  %s1494_s5 = inlined_call_operand.hbm [shape: bf16[384,128], index: 5, kind: input, shape index: {}]   ;;  %s1495_s6 = inlined_call_operand.vmem [shape: f32[1,128], index: 6, kind: input, shape index: {}]   ;;  %s1496_s7 = inlined_call_operand.hbm [shape: f32[2,128], index: 7, kind: output, shape index: {}]  }
   0x1   :  { %13 = vsyncpa [#allocation6], 0 }
   0x2   :  { %14 = vsyncpa [#allocation9], 0  ;;  %s33_s26 = sshll.u32 %s1490_s1, 4  ;;  %s34_s26 = int_to_ptr.hbm [resolvable:$true] %s33_s26 }
   0x3   :  { %15 = vsyncpa [#allocation4], 0  ;;  %s1309_s27 = smov [#allocation5]   ;;  %s59_s8 = sshll.u32 %s1492_s3, 4  ;;  %s60_s8 = int_to_ptr.hbm [resolvable:$true] %s59_s8 }
   0x4   :  { %s35_s28 = sshll.u32 %s1309_s27, 4  ;;  %s1310_s9 = smov 64   ;;  %s36_s28 = int_to_ptr.vmem [resolvable:$true] %s35_s28 }
   0x5   :  { %s1311_s10 = smov 4   ;;  %s1312_s11 = smov [#allocation8]  }
   0x6   :  { %41 = dma.hbm_to_vmem [thread:$0]  %s34_s26, 768, %s36_s28, [#allocation6], %s1310_s9, %s1310_s9, %s1311_s10  }
   0x7   :  { %s61_s12 = sshll.u32 %s1312_s11, 4  ;;  %s20_s14 = sshll.u32 %s1489_s0, 4  ;;  %s62_s12 = int_to_ptr.vmem [resolvable:$true] %s61_s12  ;;  %s21_s14 = int_to_ptr.hbm [resolvable:$true] %s20_s14 }
   0x8   :  { %67 = dma.hbm_to_vmem [thread:$0]  %s60_s8, 1280, %s62_s12, [#allocation9], %s1310_s9, %s1310_s9, %s1311_s10  }
   0x9   :  { %s1313_s3 = smov [#allocation2]   ;;  %s46_s18 = sshll.u32 %s1491_s2, 4  ;;  %s47_s18 = int_to_ptr.hbm [resolvable:$true] %s46_s18 }
   0xa   :  { %s22_s15 = sshll.u32 %s1313_s3, 4  ;;  %s1314_s19 = smov 128   ;;  %s23_s15 = int_to_ptr.vmem [resolvable:$true] %s22_s15 }
   0xb   :  { %s1315_s20 = smov 8   ;;  %s1316_s21 = smov [#allocation7]  }
   0xc   :  { %28 = dma.hbm_to_vmem [thread:$0]  %s21_s14, 512, %s23_s15, [#allocation3], %s1314_s19, %s1314_s19, %s1315_s20  }
   0xd   :  { %s48_s22 = sshll.u32 %s1316_s21, 4  ;;  %s74_s24 = sshll.u32 %s1494_s5, 4  ;;  %s49_s22 = int_to_ptr.vmem [resolvable:$true] %s48_s22  ;;  %s75_s24 = int_to_ptr.hbm [resolvable:$true] %s74_s24 }
   0xe   :  { %54 = dma.hbm_to_vmem [thread:$0]  %s47_s18, 1024, %s49_s22, [#allocation6], %s1310_s9, %s1310_s9, %s1311_s10  }
   0xf   :  { %s1317_s25 = smov [#allocation10]  }
  0x10   :  { %s76_s26 = sshll.u32 %s1317_s25, 4  ;;  %s77_s26 = int_to_ptr.vmem [resolvable:$true] %s76_s26 }
  0x11   :  { %82 = dma.hbm_to_vmem [thread:$0]  %s75_s24, 3072, %s77_s26, [#allocation9], %s1310_s9, %s1310_s9, %s1311_s10  }
  0x12   :  { %1301 = dma.done.wait [#allocation3], 512  }
  0x13   :  { %1302 = vsyncadd [#allocation3], 4294966784 }
  0x14   :  { %1303 = dma.done.wait [#allocation6], 1792  }
  0x15   :  { %1304 = vsyncadd [#allocation6], 4294965504 }
  0x16   :  { %1305 = dma.done.wait [#allocation9], 4352  }
  0x17   :  { %1306 = vsyncadd [#allocation9], 4294962944  ;;  %v1388_v0 = vld [vmem:[#allocation2] sm:$0xff]  ;;  %v1390_v1 = vld [vmem:[#allocation2 + $0x8] sm:$0xff]  ;;  %vm114_vm0 = vcmask 1046528   ;;  %vm136_vm1 = vcmask 1044480  }
  0x18   :  { %v1392_v2 = vld [vmem:[#allocation2 + $0x10] sm:$0xff]  ;;  %v115_v3 = vrot.slane %v1388_v0, 1  ;;  %v116_v4 = vrot.slane %v1390_v1, 1  ;;  %v137_v6 = vrot.slane %v1388_v0, 3  ;;  %v1398_v7 = vld [vmem:[#allocation2 + $0x18] sm:$0xff]  ;;  %v1076_v8 = vld [vmem:[#allocation7 + $0x38] sm:$0xff] }
  0x19   :  { %v118_v5 = vrot.slane %v1392_v2, 1  ;;  %v138_v9 = vrot.slane %v1390_v1, 3  ;;  %v140_v10 = vrot.slane %v1392_v2, 3  ;;  %v126_v11 = vrot.slane %v1388_v0, 2  ;;  %v1084_v13 = vld [vmem:[#allocation8 + $0x38] sm:$0xff]  ;;  %387 = vmatpush.bf16.msra.mxu1 %v1076_v8  ;;  %v1075_v18 = vld [vmem:[#allocation7 + $0x30] sm:$0xff] }
  0x1a   :  { %v127_v12 = vrot.slane %v1390_v1, 2  ;;  %v117_v14 = vsel %vm114_vm0, %v115_v3, %v116_v4  ;;  %v129_v16 = vrot.slane %v1392_v2, 2  ;;  %v120_v17 = vrot.slane %v1398_v7, 1  ;;  %v1068_v19 = vld [vmem:[#allocation5 + $0x28] sm:$0xff]  ;;  %523 = vmatpush.bf16.msra.mxu2 %v1084_v13  ;;  %v1083_v23 = vld [vmem:[#allocation8 + $0x30] sm:$0xff]  ;;  %s1318_s2 = smov 32  }
  0x1b   :  { %v119_v15 = vsel %vm114_vm0, %v116_v4, %v118_v5  ;;  %v139_v21 = vsel %vm136_vm1, %v137_v6, %v138_v9  ;;  %v141_v22 = vsel %vm136_vm1, %v138_v9, %v140_v10  ;;  %vm125_vm2 = vcmask 1045504   ;;  %259 = vmatpush.bf16.msra.mxu0 %v1068_v19  ;;  %v1067_v25 = vld [vmem:[#allocation5 + $0x20] sm:$0xff]  ;;  %v1074_v27 = vld [vmem:[#allocation7 + $0x28] sm:$0xff]  ;;  %s1319_s5 = smov 96   ;;  %v1073_v41 = vld [vmem:[#allocation7 + $0x20] sm:$0xff]  ;;  %s1320_s11 = smov [#allocation11]  }
  0x1c   :  { %v1123_v20 = vpack.i.bf16 %v119_v15, %v117_v14  ;;  %v1133_v24 = vpack.i.bf16 %v141_v22, %v139_v21  ;;  %v131_v26 = vrot.slane %v1398_v7, 2  ;;  %v1086_v28 = vld [vmem:[#allocation8 + $0x48] sm:$0xff]  ;;  %v128_v29 = vsel %vm125_vm2, %v126_v11, %v127_v12  ;;  %v1081_v44 = vld [vmem:[#allocation8 + $0x20] sm:$0xff]  ;;  %v1072_v46 = vld [vmem:[#allocation7 + $0x18] sm:$0xff]  ;;  %s851_s12 = sshll.u32 %s1320_s11, 4  ;;  %s853_s14 = sshll.u32 %s1496_s7, 4  ;;  %s852_s12 = int_to_ptr.vmem [resolvable:$true] %s851_s12  ;;  %s854_s14 = int_to_ptr.hbm [resolvable:$true] %s853_s14 }
  0x1d   :  { %v130_v30 = vsel %vm125_vm2, %v127_v12, %v129_v16  ;;  %v121_v31 = vsel %vm114_vm0, %v118_v5, %v120_v17  ;;  %388 = vmatpush.bf16.msra.mxu1 %v1075_v18  ;;  %v124_v32 = vsel %vm114_vm0, %v120_v17, %v115_v3  ;;  %v142_v35 = vrot.slane %v1398_v7, 3  ;;  %v1082_v36 = vld [vmem:[#allocation8 + $0x28] sm:$0xff]  ;;  %548 = vmatpush.bf16.msra.mxu3 %v1086_v28  ;;  %v1080_v47 = vld [vmem:[#allocation8 + $0x18] sm:$0xff]  ;;  %v1065_v48 = vld [vmem:[#allocation5 + $0x10] sm:$0xff] }
  0x1e   :  { %1124 = vrot.lane.b32.xlu0 %v1123_v20, %s1318_s2  ;;  %1134 = vrot.lane.b32.xlu1 %v1133_v24, %s1319_s5  ;;  %v132_v33 = vsel %vm125_vm2, %v129_v16, %v131_v26  ;;  %v135_v34 = vsel %vm125_vm2, %v131_v26, %v126_v11  ;;  %v1066_v38 = vld [vmem:[#allocation5 + $0x18] sm:$0xff]  ;;  %v1128_v39 = vpack.i.bf16 %v130_v30, %v128_v29  ;;  %v1071_v49 = vld [vmem:[#allocation7 + $0x10] sm:$0xff]  ;;  %v1085_v51 = vld [vmem:[#allocation8 + $0x40] sm:$0xff]  ;;  %v148_v52 = vrot.slane %v1388_v0, 4 }
  0x1f   :  { %524 = vmatpush.bf16.msra.mxu2 %v1083_v23  ;;  %v1143_v37 = vpack.i.bf16 %v135_v34, %v132_v33  ;;  %260 = vmatpush.bf16.msra.mxu0 %v1067_v25  ;;  %v1138_v40 = vpack.i.bf16 %v124_v32, %v121_v31  ;;  %v143_v42 = vsel %vm136_vm1, %v140_v10, %v142_v35  ;;  %v1079_v50 = vld [vmem:[#allocation8 + $0x10] sm:$0xff]  ;;  %v149_v53 = vrot.slane %v1390_v1, 4  ;;  %v1064_v55 = vld [vmem:[#allocation5 + $0x8] sm:$0xff]  ;;  %v1070_v58 = vld [vmem:[#allocation7 + $0x8] sm:$0xff] }
  0x20   :  { %v146_v43 = vsel %vm136_vm1, %v142_v35, %v137_v6  ;;  %v151_v54 = vrot.slane %v1392_v2, 4  ;;  %vm147_vm3 = vcmask 1043456   ;;  %v1078_v60 = vld [vmem:[#allocation8 + $0x8] sm:$0xff]  ;;  %vm190_vm4 = vcmask 261120   ;;  %v1063_v61 = vld [vmem:[#allocation5] sm:$0xff]  ;;  %v1069_v62 = vld [vmem:[#allocation7] sm:$0xff] }
  0x21   :  { %1144 = vrot.lane.b32.xlu2 %v1143_v37, %s1310_s9  ;;  %389 = vmatpush.bf16.msra.mxu1 %v1074_v27  ;;  %v1148_v45 = vpack.i.bf16 %v146_v43, %v143_v42  ;;  %v150_v56 = vsel %vm147_vm3, %v148_v52, %v149_v53  ;;  %v1077_v63 = vld [vmem:[#allocation8] sm:$0xff]  ;;  %v153_v3 = vrot.slane %v1398_v7, 4  ;;  %vm195_vm5 = vcmask 523264   ;;  %v1092_v42 = vld [vmem:[#allocation10 + $0x28] sm:$0xff]  ;;  %v1110_v43 = vld [vmem:[#allocation10 + $0xb8] sm:$0xff] }
  0x22   :  { %v152_v57 = vsel %vm147_vm3, %v149_v53, %v151_v54  ;;  %549 = vmatpush.bf16.msra.mxu3 %v1085_v51  ;;  %vm250_vm6 = vcmask 785408   ;;  %v1090_v51 = vld [vmem:[#allocation10 + $0x18] sm:$0xff]  ;;  %vm593_vm10 = vcmask 1041409  }
  0x23   :  { %525 = vmatpush.bf16.msra.mxu2 %v1082_v36  ;;  %261 = vmatpush.bf16.msra.mxu0 %v1066_v38  ;;  %v435_v59 = vpack.c.bf16 %v152_v57, %v150_v56  ;;  %v154_v4 = vsel %vm147_vm3, %v151_v54, %v153_v3  ;;  %v160_v5 = vsel %vm147_vm3, %v153_v3, %v148_v52  ;;  %v1108_v54 = vld [vmem:[#allocation10 + $0xa8] sm:$0xff]  ;;  %v1089_v57 = vld [vmem:[#allocation10 + $0x10] sm:$0xff] }
  0x24   :  { %v436_v6 = vpack.c.bf16 %v160_v5, %v154_v4  ;;  %v1106_v4 = vld [vmem:[#allocation10 + $0x98] sm:$0xff]  ;;  %v1096_v5 = vld [vmem:[#allocation10 + $0x48] sm:$0xff] }
  0x25   :  { %390 = vmatpush.bf16.msra.mxu1 %v1073_v41  ;;  %964 = vmatmul.msk.bf16.vlgmr.msra.gmra.mxu3 %vm190_vm4, %v435_v59  ;;  %v1101_v41 = vld [vmem:[#allocation10 + $0x70] sm:$0xff] }
  0x26   :  { %1129 = vrot.lane.b32.xlu0 %v1128_v39, %s1310_s9  ;;  %1139 = vrot.lane.b32.xlu1 %v1138_v40, %s1318_s2  ;;  %v1102_v40 = vld [vmem:[#allocation10 + $0x78] sm:$0xff]  ;;  %v1097_v59 = vld [vmem:[#allocation10 + $0x50] sm:$0xff] }
  0x27   :  { %526 = vmatpush.bf16.msra.mxu2 %v1081_v44  ;;  %262 = vmatpush.bf16.msra.mxu0 %v1065_v48  ;;  %v1100_v44 = vld [vmem:[#allocation10 + $0x68] sm:$0xff]  ;;  %v1099_v48 = vld [vmem:[#allocation10 + $0x60] sm:$0xff] }
  0x29   :  { %1149 = vrot.lane.b32.xlu2 %v1148_v45, %s1319_s5  ;;  %391 = vmatpush.bf16.msra.mxu1 %v1072_v46  ;;  %v161_v45 = vlaneseq  ;;  %v1091_v46 = vld [vmem:[#allocation10 + $0x20] sm:$0xff] }
  0x2b   :  { %527 = vmatpush.bf16.msra.mxu2 %v1080_v47  ;;  %263 = vmatpush.bf16.msra.mxu0 %v1064_v55  ;;  %v1109_v47 = vld [vmem:[#allocation10 + $0xb0] sm:$0xff]  ;;  %v1098_v55 = vld [vmem:[#allocation10 + $0x58] sm:$0xff] }
  0x2d   :  { %392 = vmatpush.bf16.msra.mxu1 %v1071_v49  ;;  %v162_v49 = vshrl.u32 %v161_v45, 7 }
  0x2f   :  { %528 = vmatpush.bf16.msra.mxu2 %v1079_v50  ;;  %264 = vmatpush.bf16.msra.mxu0 %v1063_v61  ;;  %v1454_v56 = vadd.s32 8, %v162_v49 }
  0x31   :  { %393 = vmatpush.bf16.msra.mxu1 %v1070_v58  ;;  %v1107_v58 = vld [vmem:[#allocation10 + $0xa0] sm:$0xff]  ;;  %vm277_vm7 = vcmp.lt.s32.totalorder %v1454_v56, 14  ;;  %vm407_vm8 = vcmp.lt.s32.totalorder %v1454_v56, 13  ;;  %vm562_vm9 = vcmp.lt.s32.totalorder %v1454_v56, 12 }
  0x33   :  { %529 = vmatpush.bf16.msra.mxu2 %v1078_v60  ;;  %818 = vmatpush.bf16.msrb.mxu0 %v1102_v40 }
  0x35   :  { %394 = vmatpush.bf16.msra.mxu1 %v1069_v62  ;;  %965 = vmatmul.msk.bf16.gmra.mxu3 %vm190_vm4, %v436_v6  ;;  %v1088_v62 = vld [vmem:[#allocation10 + $0x8] sm:$0xff] }
  0x37   :  { %530 = vmatpush.bf16.msra.mxu2 %v1077_v63  ;;  %819 = vmatpush.bf16.msrb.mxu0 %v1101_v41 }
  0x39   :  { %831 = vmatpush.bf16.msrb.mxu1 %v1110_v43 }
  0x3b   :  { %820 = vmatpush.bf16.msrb.mxu0 %v1100_v44 }
  0x3d   :  { %832 = vmatpush.bf16.msrb.mxu1 %v1109_v47 }
  0x3f   :  { %821 = vmatpush.bf16.msrb.mxu0 %v1099_v48 }
  0x41   :  { %833 = vmatpush.bf16.msrb.mxu1 %v1108_v54 }
  0x43   :  { %822 = vmatpush.bf16.msrb.mxu0 %v1098_v55 }
  0x45   :  { %834 = vmatpush.bf16.msrb.mxu1 %v1107_v58 }
  0x47   :  { %823 = vmatpush.bf16.msrb.mxu0 %v1097_v59 }
  0x49   :  { %835 = vmatpush.bf16.msrb.mxu1 %v1106_v4 }
  0x4b   :  { %824 = vmatpush.bf16.msrb.mxu0 %v1096_v5 }
  0x7b   :  { %v1145_v17 = vpop.permute.xlu2 %1144 }
  0x7c   :  { %v1147_v28 = vunpack.i.h.bf16 %v1145_v17  ;;  %v1146_v29 = vunpack.i.l.bf16 %v1145_v17 }
  0x90   :  { %v1125_v8 = vpop.permute.xlu0 %1124  ;;  %v1135_v9 = vpop.permute.xlu1 %1134 }
  0x91   :  { %v1127_v10 = vunpack.i.h.bf16 %v1125_v8  ;;  %v1126_v11 = vunpack.i.l.bf16 %v1125_v8  ;;  %v1137_v12 = vunpack.i.h.bf16 %v1135_v9  ;;  %v1136_v13 = vunpack.i.l.bf16 %v1135_v9 }
  0x93   :  { %v192_v18 = vsel %vm190_vm4, %v1390_v1, %v1127_v10  ;;  %v191_v19 = vsel %vm190_vm4, %v1388_v0, %v1126_v11  ;;  %v1150_v0 = vpop.permute.xlu2 %1149  ;;  %v1087_v10 = vld [vmem:[#allocation10] sm:$0xff] }
  0x94   :  { %v1152_v32 = vunpack.i.h.bf16 %v1150_v0  ;;  %v1151_v33 = vunpack.i.l.bf16 %v1150_v0 }
  0x98   :  { %v1130_v14 = vpop.permute.xlu0 %1129  ;;  %v1140_v26 = vpop.permute.xlu1 %1139 }
  0x99   :  { %v1132_v15 = vunpack.i.h.bf16 %v1130_v14  ;;  %v1131_v16 = vunpack.i.l.bf16 %v1130_v14  ;;  %v1142_v27 = vunpack.i.h.bf16 %v1140_v26  ;;  %v1141_v1 = vunpack.i.l.bf16 %v1140_v26 }
  0x9b   :  { %v196_v20 = vsel %vm195_vm5, %v191_v19, %v1131_v16  ;;  %v197_v21 = vsel %vm195_vm5, %v192_v18, %v1132_v15  ;;  %v194_v30 = vsel %vm190_vm4, %v1398_v7, %v1142_v27  ;;  %v193_v31 = vsel %vm190_vm4, %v1392_v2, %v1141_v1  ;;  %v1094_v7 = vld [vmem:[#allocation10 + $0x38] sm:$0xff]  ;;  %v1093_v2 = vld [vmem:[#allocation10 + $0x30] sm:$0xff] }
  0x9c   :  { %v200_v22 = vpack.c.bf16 %v197_v21, %v196_v20  ;;  %v317_v23 = vsel %vm250_vm6, %v196_v20, %v1136_v13  ;;  %v318_v24 = vsel %vm250_vm6, %v197_v21, %v1137_v12  ;;  %v198_v34 = vsel %vm195_vm5, %v193_v31, %v1146_v29  ;;  %805 = vmatpush.bf16.msrb.mxu3 %v1094_v7  ;;  %v1105_v12 = vld [vmem:[#allocation10 + $0x90] sm:$0xff]  ;;  %v1095_v13 = vld [vmem:[#allocation10 + $0x40] sm:$0xff]  ;;  %v1104_v20 = vld [vmem:[#allocation10 + $0x88] sm:$0xff] }
  0x9d   :  { %v321_v25 = vpack.c.bf16 %v318_v24, %v317_v23  ;;  %v199_v35 = vsel %vm195_vm5, %v194_v30, %v1147_v28  ;;  %v319_v36 = vsel %vm250_vm6, %v198_v34, %v1151_v33  ;;  %836 = vmatpush.bf16.msrb.mxu1 %v1105_v12  ;;  %825 = vmatpush.bf16.msrb.mxu0 %v1095_v13  ;;  %v1103_v23 = vld [vmem:[#allocation10 + $0x80] sm:$0xff] }
  0x9e   :  { %889 = vmatmul.msk.bf16.vlgmr.msra.gmra.mxu0 %vm250_vm6, %v200_v22  ;;  %v320_v37 = vsel %vm250_vm6, %v199_v35, %v1152_v32  ;;  %v201_v38 = vpack.c.bf16 %v199_v35, %v198_v34 }
  0x9f   :  { %395 = vmatmul.bf16.vlgmr.msra.gmra.mxu1 %v321_v25  ;;  %531 = vmatmul.bf16.vlgmr.msra.gmra.mxu2 %v321_v25  ;;  %v322_v39 = vpack.c.bf16 %v320_v37, %v319_v36 }
  0xa0   :  { %806 = vmatpush.bf16.msrb.mxu3 %v1093_v2 }
  0xa1   :  { %837 = vmatpush.bf16.msrb.mxu1 %v1104_v20  ;;  %v1155_v20 = vld [vmem:[%s1493_s4 + $0x2] ss:$0 sm:$0xff] }
  0xa4   :  { %807 = vmatpush.bf16.msrb.mxu3 %v1092_v42 }
  0xa5   :  { %838 = vmatpush.bf16.msrb.mxu1 %v1103_v23 }
  0xa8   :  { %808 = vmatpush.bf16.msrb.mxu3 %v1091_v46  ;;  %v551_v52 = vpop.f32.mrf.mxu3 }
  0xac   :  { %809 = vmatpush.bf16.msrb.mxu3 %v1090_v51 }
  0xae   :  { %890 = vmatmul.msk.bf16.gmra.mxu0 %vm250_vm6, %v201_v38 }
  0xaf   :  { %400 = vmatmul.bf16.gmra.mxu1 %v322_v39  ;;  %536 = vmatmul.bf16.gmra.mxu2 %v322_v39 }
  0xb0   :  { %810 = vmatpush.bf16.msrb.mxu3 %v1089_v57  ;;  %v553_v8 = vpop.f32.mrf.mxu3  ;;  %v1153_v57 = vld [vmem:[%s1493_s4] ss:$0 sm:$0xff] }
  0xb4   :  { %811 = vmatpush.bf16.msrb.mxu3 %v1088_v62 }
  0xb8   :  { %812 = vmatpush.bf16.msrb.mxu3 %v1087_v10  ;;  %v556_v27 = vpop.f32.mrf.mxu3 }
  0xc0   :  { %v558_v2 = vpop.f32.mrf.mxu3 }
 0x11b   :  { %v266_v50 = vpop.f32.mrf.mxu0 }
 0x11c   :  { %v396_v53 = vpop.f32.mrf.mxu1 }
 0x122   :  { %v532_v60 = vpop.f32.mrf.mxu2 }
 0x123   :  { %v268_v61 = vpop.f32.mrf.mxu0  ;;  %v552_v22 = vadd.f32 %v551_v52, %v532_v60 }
 0x124   :  { %v279_v63 = vsel %vm277_vm7, %v268_v61, -inf  ;;  %v398_v3 = vpop.f32.mrf.mxu1  ;;  %v1154_v61 = vld [vmem:[%s1493_s4 + $0x1] ss:$0 sm:$0xff] }
 0x125   :  { %v409_v6 = vsel %vm407_vm8, %v398_v3, -inf  ;;  %v282_v9 = vmax.f32 %v266_v50, %v279_v63 }
 0x126   :  { %v412_v11 = vmax.f32 %v396_v53, %v409_v6 }
 0x127   :  { %v283_v15 = vrot.slane %v282_v9, 4 }
 0x128   :  { %v413_v18 = vrot.slane %v412_v11, 4 }
 0x129   :  { %v284_v24 = vmax.f32 %v282_v9, %v283_v15 }
 0x12a   :  { %v534_v14 = vpop.f32.mrf.mxu2  ;;  %v414_v25 = vmax.f32 %v412_v11, %v413_v18 }
 0x12b   :  { %v554_v16 = vadd.f32 %v553_v8, %v534_v14  ;;  %v271_v17 = vpop.f32.mrf.mxu0  ;;  %v285_v28 = vrot.slane %v284_v24, 2 }
 0x12c   :  { %v401_v19 = vpop.f32.mrf.mxu1  ;;  %v415_v0 = vrot.slane %v414_v25, 2 }
 0x12d   :  { %v564_v21 = vsel %vm562_vm9, %v554_v16, -inf  ;;  %v286_v36 = vmax.f32 %v284_v24, %v285_v28 }
 0x12e   :  { %v567_v26 = vmax.f32 %v552_v22, %v564_v21  ;;  %v416_v38 = vmax.f32 %v414_v25, %v415_v0 }
 0x12f   :  { %v287_v43 = vrot.slane %v286_v36, 1 }
 0x130   :  { %v568_v30 = vrot.slane %v567_v26, 4  ;;  %v417_v46 = vrot.slane %v416_v38, 1 }
 0x131   :  { %v288_v54 = vmax.f32 %v286_v36, %v287_v43 }
 0x132   :  { %v537_v1 = vpop.f32.mrf.mxu2  ;;  %v569_v39 = vmax.f32 %v567_v26, %v568_v30  ;;  %v418_v58 = vmax.f32 %v416_v38, %v417_v46 }
 0x133   :  { %v273_v29 = vpop.f32.mrf.mxu0  ;;  %v557_v48 = vadd.f32 %v556_v27, %v537_v1  ;;  %v300_v5 = vadd.f32 %v1153_v57, %v288_v54 }
 0x134   :  { %v281_v31 = vsel %vm277_vm7, %v273_v29, -inf  ;;  %v403_v32 = vpop.f32.mrf.mxu1  ;;  %v570_v47 = vrot.slane %v569_v39, 2  ;;  %v431_v10 = vadd.f32 %v1154_v61, %v418_v58 }
 0x135   :  { %v289_v33 = vmax.f32 %v271_v17, %v281_v31  ;;  %v411_v34 = vsel %vm407_vm8, %v403_v32, -inf  ;;  %v302_v14 = vmax.f32 %v300_v5, 0.0  ;;  %v1156_v32 = vld [vmem:[%s1495_s6] ss:$0 sm:$0xff] }
 0x136   :  { %v419_v35 = vmax.f32 %v401_v19, %v411_v34  ;;  %v571_v59 = vmax.f32 %v569_v39, %v570_v47  ;;  %v433_v18 = vmax.f32 %v431_v10, 0.0 }
 0x137   :  { %v290_v37 = vrot.slane %v289_v33, 4 }
 0x138   :  { %v420_v7 = vrot.slane %v419_v35, 4  ;;  %v572_v6 = vrot.slane %v571_v59, 1 }
 0x139   :  { %v291_v40 = vmax.f32 %v289_v33, %v290_v37 }
 0x13a   :  { %v421_v41 = vmax.f32 %v419_v35, %v420_v7  ;;  %v539_v42 = vpop.f32.mrf.mxu2  ;;  %v573_v16 = vmax.f32 %v571_v59, %v572_v6 }
 0x13b   :  { %v292_v44 = vrot.slane %v291_v40, 2  ;;  %v559_v45 = vadd.f32 %v558_v2, %v539_v42 }
 0x13c   :  { %v422_v49 = vrot.slane %v421_v41, 2  ;;  %v586_v26 = vadd.f32 %v1155_v20, %v573_v16 }
 0x13d   :  { %v293_v50 = vmax.f32 %v291_v40, %v292_v44  ;;  %v566_v51 = vsel %vm562_vm9, %v559_v45, -inf }
 0x13e   :  { %v423_v52 = vmax.f32 %v421_v41, %v422_v49  ;;  %v574_v53 = vmax.f32 %v557_v48, %v566_v51  ;;  %v588_v28 = vmax.f32 %v586_v26, 0.0 }
 0x13f   :  { %v294_v55 = vrot.slane %v293_v50, 1 }
 0x140   :  { %v424_v60 = vrot.slane %v423_v52, 1  ;;  %v575_v62 = vrot.slane %v574_v53, 4 }
 0x141   :  { %v295_v63 = vmax.f32 %v293_v50, %v294_v55 }
 0x142   :  { %v425_v3 = vmax.f32 %v423_v52, %v424_v60  ;;  %v576_v56 = vmax.f32 %v574_v53, %v575_v62 }
 0x143   :  { %v301_v4 = vadd.f32 %v1153_v57, %v295_v63 }
 0x144   :  { %v432_v8 = vadd.f32 %v1154_v61, %v425_v3  ;;  %v577_v9 = vrot.slane %v576_v56, 2 }
 0x145   :  { %v303_v11 = vmax.f32 %v301_v4, 0.0 }
 0x146   :  { %v578_v12 = vmax.f32 %v576_v56, %v577_v9  ;;  %v434_v13 = vmax.f32 %v432_v8, 0.0 }
 0x147   :  { %v592_v15 = vrot.slane %v303_v11, 7 }
 0x148   :  { %v579_v17 = vrot.slane %v578_v12, 1  ;;  %v598_v19 = vrot.slane %v434_v13, 7 }
 0x149   :  { %v594_v21 = vsel %vm593_vm10, %v592_v15, %v302_v14 }
 0x14a   :  { %v580_v22 = vmax.f32 %v578_v12, %v579_v17  ;;  %v606_v23 = vpack.c.bf16 %v594_v21, %v594_v21  ;;  %v599_v24 = vsel %vm593_vm10, %v598_v19, %v433_v18 }
 0x14b   :  { %v607_v25 = vpack.c.bf16 %v599_v24, %v599_v24 }
 0x14c   :  { %813 = vmatmul.bf16.vlgmr.msrb.gmra.mxu3 %v606_v23  ;;  %v587_v27 = vadd.f32 %v1155_v20, %v580_v22 }
 0x14d   :  { %826 = vmatmul.bf16.vlgmr.msrb.gmra.mxu0 %v607_v25 }
 0x14e   :  { %v589_v1 = vmax.f32 %v587_v27, 0.0 }
 0x150   :  { %v603_v29 = vrot.slane %v589_v1, 7 }
 0x152   :  { %v604_v0 = vsel %vm593_vm10, %v603_v29, %v588_v28 }
 0x153   :  { %v608_v30 = vpack.c.bf16 %v604_v0, %v604_v0 }
 0x155   :  { %839 = vmatmul.bf16.vlgmr.msrb.gmra.mxu1 %v608_v30 }
 0x1ca   :  { %v827_v31 = vpop.f32.mrf.mxu0 }
 0x1cf   :  { %v814_v33 = vpop.f32.mrf.mxu3 }
 0x1d0   :  { %v815_v34 = vadd.f32 %v1156_v32, %v814_v33 }
 0x1d2   :  { %v829_v35 = vpop.f32.mrf.mxu0  ;;  %v828_v36 = vadd.f32 %v827_v31, %v815_v34  ;;  %v840_v37 = vpop.f32.mrf.mxu1 }
 0x1d4   :  { %v841_v38 = vadd.f32 %v840_v37, %v828_v36 }
 0x1d6   :  { %v844_v39 = vmax.f32 %v841_v38, 0.0 }
 0x1d7   :  { %v816_v7 = vpop.f32.mrf.mxu3 }
 0x1d8   :  { %845 = vst [vmem:[#allocation11] sm:$0x3] %v844_v39 }
 0x1d9   :  { %856 = dma.vmem_to_hbm [thread:$0]  %s852_s12, 32, %s854_s14, [#allocation4]  }
 0x1da   :  { %v842_v40 = vpop.f32.mrf.mxu1 }
 0x1db   :  { %1307 = dma.done.wait [#allocation4], 32  }
 0x1dc   :  { %1308 = vsyncadd [#allocation4], 4294967264 }
 0x1dd   :  { %861 = vsyncpa [#allocation3], 1 }
 0x1de   :  { %862 = vsyncpa [#allocation6], 1 }
 0x1df   :  { %863 = vsyncpa [#allocation9], 1 }
 0x1e0   :  { %864 = vsyncpa [#allocation4], 1 }

</bundles_post_ra>
